<compile_context>
chip_gen: v7x
topology: tpu7x:2x2x1
jax: 0.10.0
libtpu: 0.0.40
codegen_flags: <defaults>
</compile_context>

<pallas_src>
import functools
import math

import jax
import jax.numpy as jnp
import numpy as np
from jax.experimental import pallas as pl
from jax.experimental.pallas import tpu as pltpu


# ----------------------------------------------------------------------------
# LM head kernel:
#   j == 0:  h = LayerNorm(gelu(x @ Wd + bd)) * gamma + beta   (cached in VMEM)
#   all j :  out[:, j-tile] = h @ Wdec[:, j-tile] + b_dec[j-tile]
# ----------------------------------------------------------------------------
def lm_head_kernel(x_ref, wd_ref, bd_ref, g_ref, beta_ref, wdec_ref, bdec_ref,
                   o_ref, h_ref, *, eps):
    @pl.when(pl.program_id(1) == 0)
    def _compute_transform():
        # dense projection, f32 accumulation regardless of operand dtype
        h = jnp.dot(x_ref[...], wd_ref[...],
                    preferred_element_type=jnp.float32) + bd_ref[...]
        # exact erf GELU (matches PyTorch `gelu`); once per row tile only.
        h = h * 0.5 * (1.0 + jax.lax.erf(h * jnp.float32(1.0 / math.sqrt(2.0))))
        # LayerNorm over hidden dim (biased variance, eps) in f32
        mean = jnp.mean(h, axis=-1, keepdims=True)
        var = jnp.mean(jnp.square(h - mean), axis=-1, keepdims=True)
        h = (h - mean) * jax.lax.rsqrt(var + jnp.float32(eps))
        # cache already in the matmul dtype -> no per-vocab-tile cast later
        h_ref[...] = (h * g_ref[...] + beta_ref[...]).astype(h_ref.dtype)

    # decoder tile: one MXU pass per vocab tile, reusing the cached transform.
    o_ref[...] = (jnp.dot(h_ref[...], wdec_ref[...],
                          preferred_element_type=jnp.float32)
                  + bdec_ref[...]).astype(o_ref.dtype)


def _round_up(x, m):
    return ((x + m - 1) // m) * m


def _pad2d(a, rows, cols):
    pr, pc = rows - a.shape[0], cols - a.shape[1]
    if pr == 0 and pc == 0:
        return a
    return jnp.pad(a, ((0, pr), (0, pc)))


def bert_pretraining_heads(sequence_output, pooled_output, params, *,
                           eps=1e-12, row_tile=256, vocab_tile=1024,
                           matmul_dtype=jnp.bfloat16, out_dtype=jnp.float32):
    """sequence_output: (B, S, H); pooled_output: (B, H).

    Weights stored as (in_features, out_features) so kernels do x @ W + b.
    row_tile must be a multiple of 8, vocab_tile a multiple of 128
    (production values: row_tile 256-1024, vocab_tile 512-2048 depending on
    VMEM budget: v7x 64 MiB, v5e/v6e 128 MiB).
    """
    assert row_tile % 8 == 0
    assert vocab_tile % 128 == 0
    B, S, H = sequence_output.shape
    V = params["w_dec"].shape[1]
    M = B * S
    x = sequence_output.reshape(M, H)

    # --- tile sizes + padded extents ----------------------------------------
    m8 = _round_up(M, 8)
    tm = m8 if row_tile >= m8 else row_tile
    Mp = _round_up(M, tm)
    if vocab_tile >= V:
        tn, Vp = V, V                      # single full-width vocab block
    else:
        tn = vocab_tile
        Vp = _round_up(V, tn)

    # --- operands: bf16 (or f32) matmul inputs, f32 bias/LN params ----------
    x_p = _pad2d(x, Mp, H).astype(matmul_dtype)
    w_dense = params["w_dense"].astype(matmul_dtype)
    b_dense = params["b_dense"].astype(jnp.float32)
    gamma = params["ln_gamma"].astype(jnp.float32)
    beta = params["ln_beta"].astype(jnp.float32)
    w_dec_p = _pad2d(params["w_dec"], H, Vp).astype(matmul_dtype)
    b_dec_p = _pad2d(params["b_dec"], 1, Vp).astype(jnp.float32)

    def build_call(single_buffer_consts):
        if single_buffer_consts:
            # Constant-index inputs: block index never changes, so double
            # buffering only wastes VMEM.
            const_spec = lambda shape: pl.BlockSpec(
                shape, lambda i, j: (0, 0), pipeline_mode=pl.Buffered(1))
        else:
            const_spec = lambda shape: pl.BlockSpec(shape, lambda i, j: (0, 0))
        return pl.pallas_call(
            functools.partial(lm_head_kernel, eps=eps),
            out_shape=jax.ShapeDtypeStruct((Mp, Vp), out_dtype),
            grid=(Mp // tm, Vp // tn),
            in_specs=[
                pl.BlockSpec((tm, H), lambda i, j: (i, 0)),   # x rows
                const_spec((H, H)),                           # w_dense
                const_spec((1, H)),                           # b_dense
                const_spec((1, H)),                           # ln_gamma
                const_spec((1, H)),                           # ln_beta
                pl.BlockSpec((H, tn), lambda i, j: (0, j)),   # w_dec (streamed)
                pl.BlockSpec((1, tn), lambda i, j: (0, j)),   # decoder bias
            ],
            out_specs=pl.BlockSpec((tm, tn), lambda i, j: (i, j)),
            # transform cache kept in the matmul dtype (bf16 in production)
            scratch_shapes=[pltpu.VMEM((tm, H), matmul_dtype)],
            compiler_params=pltpu.CompilerParams(
                dimension_semantics=("parallel", "arbitrary"),
                vmem_limit_bytes=64 * 1024 * 1024),
        )

    lm_args = (x_p, w_dense, b_dense, gamma, beta, w_dec_p, b_dec_p)
    try:
        scores = build_call(True)(*lm_args)
        jax.block_until_ready(scores)
    except Exception:
        # pipeline_mode=pl.Buffered(1) not supported by this jax build; fall
        # back to default double buffering of the constant-index inputs.
        scores = build_call(False)(*lm_args)

    prediction_scores = scores[:M, :V].reshape(B, S, V)

    # seq_relationship head (H -> 2): left to plain XLA on purpose — a 2-wide
    # output lane dim forces masked partial stores and the pallas_call
    # overhead exceeds the B*H*2 FLOPs of work.
    seq_relationship_score = pooled_output @ params["w_seq"] + params["b_seq"]

    return prediction_scores, seq_relationship_score


def reference(sequence_output, pooled_output, params, eps=1e-12):
    """Plain-JAX f32 reference (PyTorch semantics) for correctness checks."""
    h = sequence_output @ params["w_dense"] + params["b_dense"][0]
    h = h * 0.5 * (1.0 + jax.lax.erf(h / jnp.sqrt(2.0)))
    mean = jnp.mean(h, axis=-1, keepdims=True)
    var = jnp.mean((h - mean) ** 2, axis=-1, keepdims=True)
    h = (h - mean) / jnp.sqrt(var + eps)
    h = h * params["ln_gamma"][0] + params["ln_beta"][0]
    pred = h @ params["w_dec"] + params["b_dec"][0]
    seq = pooled_output @ params["w_seq"] + params["b_seq"][0]
    return pred, seq


def make_params(key, H, V):
    ks = jax.random.split(key, 8)
    return {
        "w_dense": jax.random.normal(ks[0], (H, H), jnp.float32) * 0.02,
        "b_dense": jax.random.normal(ks[1], (1, H), jnp.float32) * 0.02,
        "ln_gamma": 1.0 + 0.1 * jax.random.normal(ks[2], (1, H), jnp.float32),
        "ln_beta": 0.1 * jax.random.normal(ks[3], (1, H), jnp.float32),
        "w_dec": jax.random.normal(ks[4], (H, V), jnp.float32) * 0.02,
        "b_dec": jax.random.normal(ks[5], (1, V), jnp.float32) * 0.02,
        "w_seq": jax.random.normal(ks[6], (H, 2), jnp.float32) * 0.02,
        "b_seq": jax.random.normal(ks[7], (1, 2), jnp.float32) * 0.02,
    }


if __name__ == "__main__":
    key = jax.random.PRNGKey(0)
    kp, kx, kpool, kp2, kx2, kpool2 = jax.random.split(key, 6)

    # ---- test 1: canonical small shapes, f32 matmuls, tight tolerance ------
    B, S, H, V = 2, 8, 32, 64
    params = make_params(kp, H, V)
    seq_out = jax.random.normal(kx, (B, S, H), jnp.float32)
    pooled = jax.random.normal(kpool, (B, H), jnp.float32)

    pred, seq = bert_pretraining_heads(seq_out, pooled, params,
                                       matmul_dtype=jnp.float32)
    jax.block_until_ready(pred)
    jax.block_until_ready(seq)
    pred_ref, seq_ref = reference(seq_out, pooled, params)
    assert pred.shape == (B, S, V) and seq.shape == (B, 2)
    np.testing.assert_allclose(np.asarray(pred), np.asarray(pred_ref),
                               rtol=1e-5, atol=1e-5)
    np.testing.assert_allclose(np.asarray(seq), np.asarray(seq_ref),
                               rtol=1e-5, atol=1e-5)

    # ---- test 2: non-divisible M and V — exercises tiling + zero padding ---
    B2, S2, H2, V2 = 2, 5, 32, 192          # M=10 (pad to 16), V=192 (pad to 256)
    params2 = make_params(kp2, H2, V2)
    seq_out2 = jax.random.normal(kx2, (B2, S2, H2), jnp.float32)
    pooled2 = jax.random.normal(kpool2, (B2, H2), jnp.float32)
    pred2, seq2 = bert_pretraining_heads(seq_out2, pooled2, params2,
                                         row_tile=8, vocab_tile=128,
                                         matmul_dtype=jnp.float32)
    jax.block_until_ready(pred2)
    pred2_ref, seq2_ref = reference(seq_out2, pooled2, params2)
    np.testing.assert_allclose(np.asarray(pred2), np.asarray(pred2_ref),
                               rtol=1e-5, atol=1e-5)
    np.testing.assert_allclose(np.asarray(seq2), np.asarray(seq2_ref),
                               rtol=1e-5, atol=1e-5)

    # ---- test 3: production-style bf16 matmul operands + bf16 output -------
    pred3, _ = bert_pretraining_heads(seq_out, pooled, params,
                                      matmul_dtype=jnp.bfloat16,
                                      out_dtype=jnp.bfloat16)
    jax.block_until_ready(pred3)
    np.testing.assert_allclose(np.asarray(pred3, dtype=np.float32),
                               np.asarray(pred_ref), rtol=3e-2, atol=3e-2)

    print("KERNEL_OK")
</pallas_src>

<mosaic_0001>
module attributes {stable_mosaic.version = 11 : i64} {
  func.func @lm_head_kernel(%arg0: i32, %arg1: i32, %arg2: memref<16x32xf32, #tpu.memory_space<vmem>>, %arg3: memref<32x32xf32, #tpu.memory_space<vmem>>, %arg4: memref<1x32xf32, #tpu.memory_space<vmem>>, %arg5: memref<1x32xf32, #tpu.memory_space<vmem>>, %arg6: memref<1x32xf32, #tpu.memory_space<vmem>>, %arg7: memref<32x64xf32, #tpu.memory_space<vmem>>, %arg8: memref<1x64xf32, #tpu.memory_space<vmem>>, %arg9: memref<16x64xf32, #tpu.memory_space<vmem>>, %arg10: memref<16x32xf32, #tpu.memory_space<vmem>>) attributes {dimension_semantics = [#tpu.dimension_semantics<parallel>, #tpu.dimension_semantics<arbitrary>], iteration_bounds = array<i64: 1, 1>, scalar_prefetch = 0 : i64, scratch_operands = 1 : i64, tpu.core_type = #tpu.core_type<tc>, window_params = [{transform_indices = @transform_0, window_bounds = array<i64: 16, 32>}, {pipeline_mode = #tpu.pipeline_mode<synchronous>, transform_indices = @transform_1, window_bounds = array<i64: 32, 32>}, {pipeline_mode = #tpu.pipeline_mode<synchronous>, transform_indices = @transform_2, window_bounds = array<i64: 1, 32>}, {pipeline_mode = #tpu.pipeline_mode<synchronous>, transform_indices = @transform_3, window_bounds = array<i64: 1, 32>}, {pipeline_mode = #tpu.pipeline_mode<synchronous>, transform_indices = @transform_4, window_bounds = array<i64: 1, 32>}, {transform_indices = @transform_5, window_bounds = array<i64: 32, 64>}, {transform_indices = @transform_6, window_bounds = array<i64: 1, 64>}, {transform_indices = @transform_7, window_bounds = array<i64: 16, 64>}]} {
    %c0_i32 = arith.constant 0 : i32
    %0 = arith.cmpi eq, %arg1, %c0_i32 : i32
    %1 = arith.extui %0 : i1 to i32
    %c0_i32_0 = arith.constant 0 : i32
    %2 = arith.cmpi ne, %1, %c0_i32_0 : i32
    scf.if %2 {
      %c0_8 = arith.constant 0 : index
      %c0_9 = arith.constant 0 : index
      %10 = vector.load %arg2[%c0_8, %c0_9] : memref<16x32xf32, #tpu.memory_space<vmem>>, vector<16x32xf32>
      %c0_10 = arith.constant 0 : index
      %c0_11 = arith.constant 0 : index
      %11 = vector.load %arg3[%c0_10, %c0_11] : memref<32x32xf32, #tpu.memory_space<vmem>>, vector<32x32xf32>
      %cst_12 = arith.constant dense<0.000000e+00> : vector<16x32xf32>
      %12 = tpu.matmul %10, %11, %cst_12 {dimension_numbers = #tpu.dot_dimension_numbers<[1], [0], [0], [1], [0, 0, 1, 1], [], []>} : vector<16x32xf32>, vector<32x32xf32>, vector<16x32xf32> -> vector<16x32xf32>
      %c0_13 = arith.constant 0 : index
      %c0_14 = arith.constant 0 : index
      %13 = vector.load %arg4[%c0_13, %c0_14] : memref<1x32xf32, #tpu.memory_space<vmem>>, vector<1x32xf32>
      %14 = vector.broadcast %13 : vector<1x32xf32> to vector<16x32xf32>
      %15 = arith.addf %12, %14 : vector<16x32xf32>
      %cst_15 = arith.constant 5.000000e-01 : f32
      %16 = vector.broadcast %cst_15 : f32 to vector<16x32xf32>
      %17 = arith.mulf %15, %16 : vector<16x32xf32>
      %cst_16 = arith.constant 0.707106769 : f32
      %18 = vector.broadcast %cst_16 : f32 to vector<16x32xf32>
      %19 = arith.mulf %15, %18 : vector<16x32xf32>
      %20 = math.erf %19 : vector<16x32xf32>
      %cst_17 = arith.constant 1.000000e+00 : f32
      %21 = vector.broadcast %cst_17 : f32 to vector<16x32xf32>
      %22 = arith.addf %21, %20 : vector<16x32xf32>
      %23 = arith.mulf %17, %22 : vector<16x32xf32>
      %cst_18 = arith.constant dense<0.000000e+00> : vector<16xf32>
      %24 = vector.multi_reduction <add>, %23, %cst_18 [1] : vector<16x32xf32> to vector<16xf32>
      %25 = vector.shape_cast %24 : vector<16xf32> to vector<16x1xf32>
      %cst_19 = arith.constant 3.200000e+01 : f32
      %26 = vector.broadcast %cst_19 : f32 to vector<16x1xf32>
      %27 = arith.divf %25, %26 : vector<16x1xf32>
      %28 = vector.broadcast %27 : vector<16x1xf32> to vector<16x32xf32>
      %29 = arith.subf %23, %28 : vector<16x32xf32>
      %30 = arith.mulf %29, %29 : vector<16x32xf32>
      %cst_20 = arith.constant dense<0.000000e+00> : vector<16xf32>
      %31 = vector.multi_reduction <add>, %30, %cst_20 [1] : vector<16x32xf32> to vector<16xf32>
      %32 = vector.shape_cast %31 : vector<16xf32> to vector<16x1xf32>
      %cst_21 = arith.constant 3.200000e+01 : f32
      %33 = vector.broadcast %cst_21 : f32 to vector<16x1xf32>
      %34 = arith.divf %32, %33 : vector<16x1xf32>
      %35 = vector.broadcast %27 : vector<16x1xf32> to vector<16x32xf32>
      %36 = arith.subf %23, %35 : vector<16x32xf32>
      %cst_22 = arith.constant 9.99999996E-13 : f32
      %37 = vector.broadcast %cst_22 : f32 to vector<16x1xf32>
      %38 = arith.addf %34, %37 : vector<16x1xf32>
      %39 = math.rsqrt %38 : vector<16x1xf32>
      %40 = vector.broadcast %39 : vector<16x1xf32> to vector<16x32xf32>
      %41 = arith.mulf %36, %40 : vector<16x32xf32>
      %c0_23 = arith.constant 0 : index
      %c0_24 = arith.constant 0 : index
      %42 = vector.load %arg5[%c0_23, %c0_24] : memref<1x32xf32, #tpu.memory_space<vmem>>, vector<1x32xf32>
      %43 = vector.broadcast %42 : vector<1x32xf32> to vector<16x32xf32>
      %44 = arith.mulf %41, %43 : vector<16x32xf32>
      %c0_25 = arith.constant 0 : index
      %c0_26 = arith.constant 0 : index
      %45 = vector.load %arg6[%c0_25, %c0_26] : memref<1x32xf32, #tpu.memory_space<vmem>>, vector<1x32xf32>
      %46 = vector.broadcast %45 : vector<1x32xf32> to vector<16x32xf32>
      %47 = arith.addf %44, %46 : vector<16x32xf32>
      %c0_27 = arith.constant 0 : index
      %c0_28 = arith.constant 0 : index
      %48 = vector.load %arg10[%c0_27, %c0_28] : memref<16x32xf32, #tpu.memory_space<vmem>>, vector<16x32xf32>
      tpu.vector_store %arg10[%c0_27, %c0_28], %47 {strides = array<i32>} : memref<16x32xf32, #tpu.memory_space<vmem>>, vector<16x32xf32>,
    } else {
    }
    %c0 = arith.constant 0 : index
    %c0_1 = arith.constant 0 : index
    %3 = vector.load %arg10[%c0, %c0_1] : memref<16x32xf32, #tpu.memory_space<vmem>>, vector<16x32xf32>
    %c0_2 = arith.constant 0 : index
    %c0_3 = arith.constant 0 : index
    %4 = vector.load %arg7[%c0_2, %c0_3] : memref<32x64xf32, #tpu.memory_space<vmem>>, vector<32x64xf32>
    %cst = arith.constant dense<0.000000e+00> : vector<16x64xf32>
    %5 = tpu.matmul %3, %4, %cst {dimension_numbers = #tpu.dot_dimension_numbers<[1], [0], [0], [1], [0, 0, 1, 1], [], []>} : vector<16x32xf32>, vector<32x64xf32>, vector<16x64xf32> -> vector<16x64xf32>
    %c0_4 = arith.constant 0 : index
    %c0_5 = arith.constant 0 : index
    %6 = vector.load %arg8[%c0_4, %c0_5] : memref<1x64xf32, #tpu.memory_space<vmem>>, vector<1x64xf32>
    %7 = vector.broadcast %6 : vector<1x64xf32> to vector<16x64xf32>
    %8 = arith.addf %5, %7 : vector<16x64xf32>
    %c0_6 = arith.constant 0 : index
    %c0_7 = arith.constant 0 : index
    %9 = vector.load %arg9[%c0_6, %c0_7] : memref<16x64xf32, #tpu.memory_space<vmem>>, vector<16x64xf32>
    tpu.vector_store %arg9[%c0_6, %c0_7], %8 {strides = array<i32>} : memref<16x64xf32, #tpu.memory_space<vmem>>, vector<16x64xf32>,
    return
  }
  func.func @transform_0(%arg0: i32, %arg1: i32) -> (i32, i32) {
    %c0_i32 = arith.constant 0 : i32
    %c0_i32_0 = arith.constant 0 : i32
    return %arg0, %c0_i32 : i32, i32
  }
  func.func @transform_1(%arg0: i32, %arg1: i32) -> (i32, i32) {
    %c0_i32 = arith.constant 0 : i32
    %c0_i32_0 = arith.constant 0 : i32
    %c0_i32_1 = arith.constant 0 : i32
    return %c0_i32, %c0_i32_0 : i32, i32
  }
  func.func @transform_2(%arg0: i32, %arg1: i32) -> (i32, i32) {
    %c0_i32 = arith.constant 0 : i32
    %c0_i32_0 = arith.constant 0 : i32
    %c0_i32_1 = arith.constant 0 : i32
    return %c0_i32, %c0_i32_0 : i32, i32
  }
  func.func @transform_3(%arg0: i32, %arg1: i32) -> (i32, i32) {
    %c0_i32 = arith.constant 0 : i32
    %c0_i32_0 = arith.constant 0 : i32
    %c0_i32_1 = arith.constant 0 : i32
    return %c0_i32, %c0_i32_0 : i32, i32
  }
  func.func @transform_4(%arg0: i32, %arg1: i32) -> (i32, i32) {
    %c0_i32 = arith.constant 0 : i32
    %c0_i32_0 = arith.constant 0 : i32
    %c0_i32_1 = arith.constant 0 : i32
    return %c0_i32, %c0_i32_0 : i32, i32
  }
  func.func @transform_5(%arg0: i32, %arg1: i32) -> (i32, i32) {
    %c0_i32 = arith.constant 0 : i32
    %c0_i32_0 = arith.constant 0 : i32
    return %c0_i32, %arg1 : i32, i32
  }
  func.func @transform_6(%arg0: i32, %arg1: i32) -> (i32, i32) {
    %c0_i32 = arith.constant 0 : i32
    %c0_i32_0 = arith.constant 0 : i32
    return %c0_i32, %arg1 : i32, i32
  }
  func.func @transform_7(%arg0: i32, %arg1: i32) -> (i32, i32) {
    %c0_i32 = arith.constant 0 : i32
    return %arg0, %arg1 : i32, i32
  }
}

module attributes {stable_mosaic.version = 11 : i64} {
  func.func @lm_head_kernel(%arg0: i32, %arg1: i32, %arg2: memref<16x32xf32, #tpu.memory_space<vmem>>, %arg3: memref<32x32xf32, #tpu.memory_space<vmem>>, %arg4: memref<1x32xf32, #tpu.memory_space<vmem>>, %arg5: memref<1x32xf32, #tpu.memory_space<vmem>>, %arg6: memref<1x32xf32, #tpu.memory_space<vmem>>, %arg7: memref<32x64xf32, #tpu.memory_space<vmem>>, %arg8: memref<1x64xf32, #tpu.memory_space<vmem>>, %arg9: memref<16x64xf32, #tpu.memory_space<vmem>>, %arg10: memref<16x32xf32, #tpu.memory_space<vmem>>) attributes {dimension_semantics = [#tpu.dimension_semantics<parallel>, #tpu.dimension_semantics<arbitrary>], iteration_bounds = array<i64: 1, 1>, scalar_prefetch = 0 : i64, scratch_operands = 1 : i64, tpu.core_type = #tpu.core_type<tc>, window_params = [{transform_indices = @transform_0, window_bounds = array<i64: 16, 32>}, {pipeline_mode = #tpu.pipeline_mode<synchronous>, transform_indices = @transform_1, window_bounds = array<i64: 32, 32>}, {pipeline_mode = #tpu.pipeline_mode<synchronous>, transform_indices = @transform_2, window_bounds = array<i64: 1, 32>}, {pipeline_mode = #tpu.pipeline_mode<synchronous>, transform_indices = @transform_3, window_bounds = array<i64: 1, 32>}, {pipeline_mode = #tpu.pipeline_mode<synchronous>, transform_indices = @transform_4, window_bounds = array<i64: 1, 32>}, {transform_indices = @transform_5, window_bounds = array<i64: 32, 64>}, {transform_indices = @transform_6, window_bounds = array<i64: 1, 64>}, {transform_indices = @transform_7, window_bounds = array<i64: 16, 64>}]} {
    %c0_i32 = arith.constant 0 : i32
    %0 = arith.cmpi eq, %arg1, %c0_i32 : i32
    %1 = arith.extui %0 : i1 to i32
    %c0_i32_0 = arith.constant 0 : i32
    %2 = arith.cmpi ne, %1, %c0_i32_0 : i32
    scf.if %2 {
      %c0_8 = arith.constant 0 : index
      %c0_9 = arith.constant 0 : index
      %10 = vector.load %arg2[%c0_8, %c0_9] : memref<16x32xf32, #tpu.memory_space<vmem>>, vector<16x32xf32>
      %c0_10 = arith.constant 0 : index
      %c0_11 = arith.constant 0 : index
      %11 = vector.load %arg3[%c0_10, %c0_11] : memref<32x32xf32, #tpu.memory_space<vmem>>, vector<32x32xf32>
      %cst_12 = arith.constant dense<0.000000e+00> : vector<16x32xf32>
      %12 = tpu.matmul %10, %11, %cst_12 {dimension_numbers = #tpu.dot_dimension_numbers<[1], [0], [0], [1], [0, 0, 1, 1], [], []>} : vector<16x32xf32>, vector<32x32xf32>, vector<16x32xf32> -> vector<16x32xf32>
      %c0_13 = arith.constant 0 : index
      %c0_14 = arith.constant 0 : index
      %13 = vector.load %arg4[%c0_13, %c0_14] : memref<1x32xf32, #tpu.memory_space<vmem>>, vector<1x32xf32>
      %14 = vector.broadcast %13 : vector<1x32xf32> to vector<16x32xf32>
      %15 = arith.addf %12, %14 : vector<16x32xf32>
      %cst_15 = arith.constant 5.000000e-01 : f32
      %16 = vector.broadcast %cst_15 : f32 to vector<16x32xf32>
      %17 = arith.mulf %15, %16 : vector<16x32xf32>
      %cst_16 = arith.constant 0.707106769 : f32
      %18 = vector.broadcast %cst_16 : f32 to vector<16x32xf32>
      %19 = arith.mulf %15, %18 : vector<16x32xf32>
      %20 = math.erf %19 : vector<16x32xf32>
      %cst_17 = arith.constant 1.000000e+00 : f32
      %21 = vector.broadcast %cst_17 : f32 to vector<16x32xf32>
      %22 = arith.addf %21, %20 : vector<16x32xf32>
      %23 = arith.mulf %17, %22 : vector<16x32xf32>
      %cst_18 = arith.constant dense<0.000000e+00> : vector<16xf32>
      %24 = vector.multi_reduction <add>, %23, %cst_18 [1] : vector<16x32xf32> to vector<16xf32>
      %25 = vector.shape_cast %24 : vector<16xf32> to vector<16x1xf32>
      %cst_19 = arith.constant 3.200000e+01 : f32
      %26 = vector.broadcast %cst_19 : f32 to vector<16x1xf32>
      %27 = arith.divf %25, %26 : vector<16x1xf32>
      %28 = vector.broadcast %27 : vector<16x1xf32> to vector<16x32xf32>
      %29 = arith.subf %23, %28 : vector<16x32xf32>
      %30 = arith.mulf %29, %29 : vector<16x32xf32>
      %cst_20 = arith.constant dense<0.000000e+00> : vector<16xf32>
      %31 = vector.multi_reduction <add>, %30, %cst_20 [1] : vector<16x32xf32> to vector<16xf32>
      %32 = vector.shape_cast %31 : vector<16xf32> to vector<16x1xf32>
      %cst_21 = arith.constant 3.200000e+01 : f32
      %33 = vector.broadcast %cst_21 : f32 to vector<16x1xf32>
      %34 = arith.divf %32, %33 : vector<16x1xf32>
      %35 = vector.broadcast %27 : vector<16x1xf32> to vector<16x32xf32>
      %36 = arith.subf %23, %35 : vector<16x32xf32>
      %cst_22 = arith.constant 9.99999996E-13 : f32
      %37 = vector.broadcast %cst_22 : f32 to vector<16x1xf32>
      %38 = arith.addf %34, %37 : vector<16x1xf32>
      %39 = math.rsqrt %38 : vector<16x1xf32>
      %40 = vector.broadcast %39 : vector<16x1xf32> to vector<16x32xf32>
      %41 = arith.mulf %36, %40 : vector<16x32xf32>
      %c0_23 = arith.constant 0 : index
      %c0_24 = arith.constant 0 : index
      %42 = vector.load %arg5[%c0_23, %c0_24] : memref<1x32xf32, #tpu.memory_space<vmem>>, vector<1x32xf32>
      %43 = vector.broadcast %42 : vector<1x32xf32> to vector<16x32xf32>
      %44 = arith.mulf %41, %43 : vector<16x32xf32>
      %c0_25 = arith.constant 0 : index
      %c0_26 = arith.constant 0 : index
      %45 = vector.load %arg6[%c0_25, %c0_26] : memref<1x32xf32, #tpu.memory_space<vmem>>, vector<1x32xf32>
      %46 = vector.broadcast %45 : vector<1x32xf32> to vector<16x32xf32>
      %47 = arith.addf %44, %46 : vector<16x32xf32>
      %c0_27 = arith.constant 0 : index
      %c0_28 = arith.constant 0 : index
      %48 = vector.load %arg10[%c0_27, %c0_28] : memref<16x32xf32, #tpu.memory_space<vmem>>, vector<16x32xf32>
      tpu.vector_store %arg10[%c0_27, %c0_28], %47 {strides = array<i32>} : memref<16x32xf32, #tpu.memory_space<vmem>>, vector<16x32xf32>,
    } else {
    }
    %c0 = arith.constant 0 : index
    %c0_1 = arith.constant 0 : index
    %3 = vector.load %arg10[%c0, %c0_1] : memref<16x32xf32, #tpu.memory_space<vmem>>, vector<16x32xf32>
    %c0_2 = arith.constant 0 : index
    %c0_3 = arith.constant 0 : index
    %4 = vector.load %arg7[%c0_2, %c0_3] : memref<32x64xf32, #tpu.memory_space<vmem>>, vector<32x64xf32>
    %cst = arith.constant dense<0.000000e+00> : vector<16x64xf32>
    %5 = tpu.matmul %3, %4, %cst {dimension_numbers = #tpu.dot_dimension_numbers<[1], [0], [0], [1], [0, 0, 1, 1], [], []>} : vector<16x32xf32>, vector<32x64xf32>, vector<16x64xf32> -> vector<16x64xf32>
    %c0_4 = arith.constant 0 : index
    %c0_5 = arith.constant 0 : index
    %6 = vector.load %arg8[%c0_4, %c0_5] : memref<1x64xf32, #tpu.memory_space<vmem>>, vector<1x64xf32>
    %7 = vector.broadcast %6 : vector<1x64xf32> to vector<16x64xf32>
    %8 = arith.addf %5, %7 : vector<16x64xf32>
    %c0_6 = arith.constant 0 : index
    %c0_7 = arith.constant 0 : index
    %9 = vector.load %arg9[%c0_6, %c0_7] : memref<16x64xf32, #tpu.memory_space<vmem>>, vector<16x64xf32>
    tpu.vector_store %arg9[%c0_6, %c0_7], %8 {strides = array<i32>} : memref<16x64xf32, #tpu.memory_space<vmem>>, vector<16x64xf32>,
    return
  }
  func.func @transform_0(%arg0: i32, %arg1: i32) -> (i32, i32) {
    %c0_i32 = arith.constant 0 : i32
    %c0_i32_0 = arith.constant 0 : i32
    return %arg0, %c0_i32 : i32, i32
  }
  func.func @transform_1(%arg0: i32, %arg1: i32) -> (i32, i32) {
    %c0_i32 = arith.constant 0 : i32
    %c0_i32_0 = arith.constant 0 : i32
    %c0_i32_1 = arith.constant 0 : i32
    return %c0_i32, %c0_i32_0 : i32, i32
  }
  func.func @transform_2(%arg0: i32, %arg1: i32) -> (i32, i32) {
    %c0_i32 = arith.constant 0 : i32
    %c0_i32_0 = arith.constant 0 : i32
    %c0_i32_1 = arith.constant 0 : i32
    return %c0_i32, %c0_i32_0 : i32, i32
  }
  func.func @transform_3(%arg0: i32, %arg1: i32) -> (i32, i32) {
    %c0_i32 = arith.constant 0 : i32
    %c0_i32_0 = arith.constant 0 : i32
    %c0_i32_1 = arith.constant 0 : i32
    return %c0_i32, %c0_i32_0 : i32, i32
  }
  func.func @transform_4(%arg0: i32, %arg1: i32) -> (i32, i32) {
    %c0_i32 = arith.constant 0 : i32
    %c0_i32_0 = arith.constant 0 : i32
    %c0_i32_1 = arith.constant 0 : i32
    return %c0_i32, %c0_i32_0 : i32, i32
  }
  func.func @transform_5(%arg0: i32, %arg1: i32) -> (i32, i32) {
    %c0_i32 = arith.constant 0 : i32
    %c0_i32_0 = arith.constant 0 : i32
    return %c0_i32, %arg1 : i32, i32
  }
  func.func @transform_6(%arg0: i32, %arg1: i32) -> (i32, i32) {
    %c0_i32 = arith.constant 0 : i32
    %c0_i32_0 = arith.constant 0 : i32
    return %c0_i32, %arg1 : i32, i32
  }
  func.func @transform_7(%arg0: i32, %arg1: i32) -> (i32, i32) {
    %c0_i32 = arith.constant 0 : i32
    return %arg0, %arg1 : i32, i32
  }
}

</mosaic_0001>

<bundles_post_ra>
// kernel: tpu_custom_call.1
= control target key start
LH: loop header
LB: loop body
LE: loop exit
PB: predicated region body
PF: predicated region fallthrough
CT: control target
= control target key end

     0   :  { %12 = vsyncpa [#allocation4], 0  ;;  %s833_s0 = inlined_call_operand.hbm [shape: f32[16,32], index: 0, kind: input, shape index: {}]   ;;  %s834_s1 = inlined_call_operand.hbm [shape: f32[32,32], index: 1, kind: input, shape index: {}]   ;;  %s835_s2 = inlined_call_operand.hbm [shape: f32[1,32], index: 2, kind: input, shape index: {}]   ;;  %s836_s3 = inlined_call_operand.hbm [shape: f32[1,32], index: 3, kind: input, shape index: {}]   ;;  %s837_s4 = inlined_call_operand.hbm [shape: f32[1,32], index: 4, kind: input, shape index: {}]   ;;  %s838_s5 = inlined_call_operand.hbm [shape: f32[32,64], index: 5, kind: input, shape index: {}]   ;;  %s839_s6 = inlined_call_operand.hbm [shape: f32[1,64], index: 6, kind: input, shape index: {}]   ;;  %s840_s7 = inlined_call_operand.hbm [shape: f32[16,64], index: 7, kind: output, shape index: {}]  }
   0x1   :  { %13 = vsyncpa [#allocation7], 0 }
   0x2   :  { %14 = vsyncpa [#allocation10], 0 }
   0x3   :  { %15 = vsyncpa [#allocation13], 0 }
   0x4   :  { %16 = vsyncpa [#allocation5], 0  ;;  %s650_s24 = smov [#allocation6]   ;;  %s651_s26 = smov [#allocation9]  }
   0x5   :  { %s34_s25 = sshll.u32 %s650_s24, 4  ;;  %s57_s27 = sshll.u32 %s651_s26, 4  ;;  %s35_s25 = int_to_ptr.vmem [resolvable:$true] %s34_s25  ;;  %s700_s27 = int_to_ptr.vmem [resolvable:$true] %s57_s27 }
   0x6   :  { %s464_s30 = scalar_lea.hbm %s834_s1, 512 }
   0x7   :  { %p465_p0 = scmp.ne.s32.totalorder %s834_s1, %s464_s30  ;;  %p468_p1 = scmp.lt.u32.totalorder %s464_s30, %s834_s1 }
   0x9   :  { %p470_p2 = pnand %p468_p1, %p465_p0 }
   0xb   :  { %473 = shalt.err (!%p470_p2)
}
   0xc   :  { %s474_s12 = scalar_lea.vmem %s35_s25, 512  ;;  %p479_p4 = scmp.lt.s32.totalorder %s35_s25, %s35_s25 }
   0xd   :  { %p475_p3 = scmp.ne.s32.totalorder %s35_s25, %s474_s12  ;;  %p480_p5 = scmp.lt.s32.totalorder %s474_s12, %s474_s12 }
   0xf   :  { %p481_p6 = por %p480_p5, %p479_p4 }
  0x11   :  { %p482_p7 = pnand %p481_p6, %p475_p3 }
  0x13   :  { %485 = shalt.err (!%p482_p7)
}
  0x14   :  { %s652_s13 = smov 128   ;;  %s653_s14 = smov 8  }
  0x15   :  { %40 = dma.hbm_to_vmem [thread:$0]  %s834_s1, 512, %s35_s25, [#allocation7], %s652_s13, %s652_s13, %s653_s14  }
  0x16   :  { %s486_s19 = scalar_lea.hbm %s836_s3, 16 }
  0x17   :  { %p487_p8 = scmp.ne.s32.totalorder %s836_s3, %s486_s19  ;;  %p490_p9 = scmp.lt.u32.totalorder %s486_s19, %s836_s3 }
  0x19   :  { %p492_p10 = pnand %p490_p9, %p487_p8 }
  0x1b   :  { %495 = shalt.err (!%p492_p10)
}
  0x1c   :  { %s496_s24 = scalar_lea.vmem %s700_s27, 16  ;;  %s500_s1 = scalar_lea.vmem %s700_s27, 32 }
  0x1d   :  { %p497_p11 = scmp.ne.s32.totalorder %s700_s27, %s496_s24  ;;  %p501_p12 = scmp.lt.s32.totalorder %s700_s27, %s700_s27 }
  0x1e   :  { %p502_p13 = scmp.lt.s32.totalorder %s500_s1, %s496_s24 }
  0x20   :  { %p503_p0 = por %p502_p13, %p501_p12 }
  0x22   :  { %p504_p1 = pnand %p503_p0, %p497_p11 }
  0x24   :  { %507 = shalt.err (!%p504_p1)
}
  0x25   :  { %60 = dma.hbm_to_vmem [thread:$0]  %s836_s3, 16, %s700_s27, [#allocation10]  }
  0x26   :  { %s654_s28 = smov [#allocation12]   ;;  %s655_s30 = smov [#allocation3]  }
  0x27   :  { %s76_s29 = sshll.u32 %s654_s28, 4  ;;  %s22_s8 = sshll.u32 %s655_s30, 4  ;;  %s77_s29 = int_to_ptr.vmem [resolvable:$true] %s76_s29  ;;  %s735_s8 = int_to_ptr.vmem [resolvable:$true] %s22_s8 }
  0x28   :  { %s508_s11 = scalar_lea.hbm %s838_s5, 512 }
  0x29   :  { %p509_p2 = scmp.ne.s32.totalorder %s838_s5, %s508_s11  ;;  %p512_p3 = scmp.lt.u32.totalorder %s508_s11, %s838_s5 }
  0x2b   :  { %p514_p4 = pnand %p512_p3, %p509_p2 }
  0x2d   :  { %517 = shalt.err (!%p514_p4)
}
  0x2e   :  { %s518_s3 = scalar_lea.vmem %s77_s29, 512  ;;  %p523_p6 = scmp.lt.s32.totalorder %s77_s29, %s77_s29 }
  0x2f   :  { %p519_p5 = scmp.ne.s32.totalorder %s77_s29, %s518_s3  ;;  %p524_p7 = scmp.lt.s32.totalorder %s518_s3, %s518_s3 }
  0x31   :  { %p525_p8 = por %p524_p7, %p523_p6 }
  0x33   :  { %p526_p9 = pnand %p525_p8, %p519_p5 }
  0x35   :  { %529 = shalt.err (!%p526_p9)
}
  0x36   :  { %82 = dma.hbm_to_vmem [thread:$0]  %s838_s5, 512, %s77_s29, [#allocation13], %s652_s13, %s652_s13, %s653_s14  }
  0x37   :  { %s530_s21 = scalar_lea.hbm %s833_s0, 256 }
  0x38   :  { %p531_p10 = scmp.ne.s32.totalorder %s833_s0, %s530_s21  ;;  %p534_p11 = scmp.lt.u32.totalorder %s530_s21, %s833_s0 }
  0x3a   :  { %p536_p12 = pnand %p534_p11, %p531_p10 }
  0x3c   :  { %539 = shalt.err (!%p536_p12)
}
  0x3d   :  { %s540_s25 = scalar_lea.vmem %s735_s8, 256  ;;  %p545_p0 = scmp.lt.s32.totalorder %s735_s8, %s735_s8 }
  0x3e   :  { %p541_p13 = scmp.ne.s32.totalorder %s735_s8, %s540_s25  ;;  %p546_p1 = scmp.lt.s32.totalorder %s540_s25, %s540_s25 }
  0x40   :  { %p547_p2 = por %p546_p1, %p545_p0 }
  0x42   :  { %p548_p3 = pnand %p547_p2, %p541_p13 }
  0x44   :  { %551 = shalt.err (!%p548_p3)
}
  0x45   :  { %28 = dma.hbm_to_vmem [thread:$0]  %s833_s0, 256, %s735_s8, [#allocation4], %s652_s13, %s652_s13, %s653_s14  }
  0x46   :  { %s656_s28 = smov [#allocation8]   ;;  %s657_s30 = smov [#allocation11]  }
  0x47   :  { %s47_s29 = sshll.u32 %s656_s28, 4  ;;  %s67_s9 = sshll.u32 %s657_s30, 4  ;;  %s48_s29 = int_to_ptr.vmem [resolvable:$true] %s47_s29  ;;  %s68_s9 = int_to_ptr.vmem [resolvable:$true] %s67_s9 }
  0x48   :  { %s552_s12 = scalar_lea.hbm %s835_s2, 16 }
  0x49   :  { %p553_p4 = scmp.ne.s32.totalorder %s835_s2, %s552_s12  ;;  %p556_p5 = scmp.lt.u32.totalorder %s552_s12, %s835_s2 }
  0x4b   :  { %p558_p6 = pnand %p556_p5, %p553_p4 }
  0x4d   :  { %561 = shalt.err (!%p558_p6)
}
  0x4e   :  { %s562_s0 = scalar_lea.vmem %s48_s29, 16  ;;  %s566_s8 = scalar_lea.vmem %s48_s29, 32 }
  0x4f   :  { %p563_p7 = scmp.ne.s32.totalorder %s48_s29, %s562_s0  ;;  %p567_p8 = scmp.lt.s32.totalorder %s48_s29, %s48_s29 }
  0x50   :  { %p568_p9 = scmp.lt.s32.totalorder %s566_s8, %s562_s0 }
  0x52   :  { %p569_p10 = por %p568_p9, %p567_p8 }
  0x54   :  { %p570_p11 = pnand %p569_p10, %p563_p7 }
  0x56   :  { %573 = shalt.err (!%p570_p11)
}
  0x57   :  { %50 = dma.hbm_to_vmem [thread:$0]  %s835_s2, 16, %s48_s29, [#allocation7]  }
  0x58   :  { %s574_s21 = scalar_lea.hbm %s837_s4, 16 }
  0x59   :  { %p575_p12 = scmp.ne.s32.totalorder %s837_s4, %s574_s21  ;;  %p578_p13 = scmp.lt.u32.totalorder %s574_s21, %s837_s4 }
  0x5b   :  { %p580_p0 = pnand %p578_p13, %p575_p12 }
  0x5d   :  { %583 = shalt.err (!%p580_p0)
}
  0x5e   :  { %s584_s25 = scalar_lea.vmem %s68_s9, 16  ;;  %s588_s5 = scalar_lea.vmem %s68_s9, 32 }
  0x5f   :  { %p585_p1 = scmp.ne.s32.totalorder %s68_s9, %s584_s25  ;;  %p589_p2 = scmp.lt.s32.totalorder %s68_s9, %s68_s9 }
  0x60   :  { %p590_p3 = scmp.lt.s32.totalorder %s588_s5, %s584_s25 }
  0x62   :  { %p591_p4 = por %p590_p3, %p589_p2 }
  0x64   :  { %p592_p5 = pnand %p591_p4, %p585_p1 }
  0x66   :  { %595 = shalt.err (!%p592_p5)
}
  0x67   :  { %70 = dma.hbm_to_vmem [thread:$0]  %s837_s4, 16, %s68_s9, [#allocation10]  }
  0x68   :  { %s658_s28 = smov [#allocation14]   ;;  %s596_s11 = scalar_lea.hbm %s839_s6, 16 }
  0x69   :  { %s89_s29 = sshll.u32 %s658_s28, 4  ;;  %p597_p6 = scmp.ne.s32.totalorder %s839_s6, %s596_s11  ;;  %s90_s29 = int_to_ptr.vmem [resolvable:$true] %s89_s29 }
  0x6a   :  { %p600_p7 = scmp.lt.u32.totalorder %s596_s11, %s839_s6 }
  0x6c   :  { %p602_p8 = pnand %p600_p7, %p597_p6 }
  0x6e   :  { %605 = shalt.err (!%p602_p8)
}
  0x6f   :  { %s606_s3 = scalar_lea.vmem %s90_s29, 16  ;;  %s610_s4 = scalar_lea.vmem %s90_s29, 32 }
  0x70   :  { %p607_p9 = scmp.ne.s32.totalorder %s90_s29, %s606_s3  ;;  %p611_p10 = scmp.lt.s32.totalorder %s90_s29, %s90_s29 }
  0x71   :  { %p612_p11 = scmp.lt.s32.totalorder %s610_s4, %s606_s3 }
  0x73   :  { %p613_p12 = por %p612_p11, %p611_p10 }
  0x75   :  { %p614_p13 = pnand %p613_p12, %p607_p9 }
  0x77   :  { %617 = shalt.err (!%p614_p13)
}
  0x78   :  { %92 = dma.hbm_to_vmem [thread:$0]  %s839_s6, 16, %s90_s29, [#allocation13]  }
  0x79   :  { %640 = dma.done.wait [#allocation4], 256  }
  0x7a   :  { %641 = vsyncadd [#allocation4], 4294967040 }
  0x7b   :  { %642 = dma.done.wait [#allocation7], 528  }
  0x7c   :  { %643 = vsyncadd [#allocation7], 4294966768 }
  0x7d   :  { %644 = dma.done.wait [#allocation10], 32  }
  0x7e   :  { %645 = vsyncadd [#allocation10], 4294967264 }
  0x7f   :  { %646 = dma.done.wait [#allocation13], 528  }
  0x80   :  { %647 = vsyncadd [#allocation13], 4294966768  ;;  %vm131_vm0 = vcmask 261120   ;;  %v120_v0 = vld [vmem:[#allocation6] sm:$0xff]  ;;  %v121_v1 = vld [vmem:[#allocation6 + $0x8] sm:$0xff]  ;;  %s659_s6 = smov [#allocation15]  }
  0x81   :  { %v122_v2 = vld [vmem:[#allocation6 + $0x10] sm:$0xff]  ;;  %v430_v3 = vpack.c.bf16 %v121_v1, %v120_v0  ;;  %v123_v4 = vld [vmem:[#allocation6 + $0x18] sm:$0xff]  ;;  %v388_v8 = vld [vmem:[#allocation8] ss:$0 sm:$0xff]  ;;  %s373_s8 = sshll.u32 %s659_s6, 4  ;;  %vm365_vm1 = vcmask 523264   ;;  %s374_s8 = int_to_ptr.vmem [resolvable:$true] %s373_s8 }
  0x82   :  { %v118_v5 = vld [vmem:[#allocation3] sm:$0xff]  ;;  %v434_v6 = vpack.c.bf16 %v123_v4, %v122_v2  ;;  %v119_v7 = vld [vmem:[#allocation3 + $0x8] sm:$0xff]  ;;  %v272_v35 = vld [vmem:[#allocation12] sm:$0xff]  ;;  %s618_s27 = scalar_lea.vmem %s374_s8, 256  ;;  %p623_p1 = scmp.lt.s32.totalorder %s374_s8, %s374_s8 }
  0x83   :  { %416 = vmatprep.mubr.msk.f32.mxu0 %vm131_vm0, %v118_v5  ;;  %431 = vmatprep.subr.bf16.mxu0 %v430_v3  ;;  %v273_v36 = vld [vmem:[#allocation12 + $0x8] sm:$0xff]  ;;  %v274_v38 = vld [vmem:[#allocation12 + $0x10] sm:$0xff]  ;;  %v275_v39 = vld [vmem:[#allocation12 + $0x18] sm:$0xff]  ;;  %p619_p0 = scmp.ne.s32.totalorder %s374_s8, %s618_s27  ;;  %p624_p2 = scmp.lt.s32.totalorder %s618_s27, %s618_s27 }
  0x84   :  { %433 = vmatpush3.bf16.msra.mxu0 %v430_v3  ;;  %v438_v37 = vpack.c.bf16 %v273_v36, %v272_v35  ;;  %v442_v40 = vpack.c.bf16 %v275_v39, %v274_v38  ;;  %v391_v48 = vld [vmem:[#allocation9] ss:$0 sm:$0xff]  ;;  %v392_v50 = vld [vmem:[#allocation11] ss:$0 sm:$0xff]  ;;  %v393_v59 = vld [vmem:[#allocation14] ss:$0 sm:$0xff] }
  0x85   :  { %435 = vmatprep.subr.bf16.mxu0 %v434_v6  ;;  %p625_p3 = por %p624_p2, %p623_p1 }
  0x86   :  { %439 = vmatprep.subr.bf16.mxu1 %v438_v37 }
  0x87   :  { %441 = vmatpush3.bf16.msra.mxu1 %v438_v37  ;;  %p626_p4 = pnand %p625_p3, %p619_p0 }
  0x88   :  { %437 = vmatpush3.bf16.msra.mxu0 %v434_v6  ;;  %443 = vmatprep.subr.bf16.mxu1 %v442_v40 }
  0x8b   :  { %417 = vmatmul.mubr.msk.f32.vlgmr.msra.gmra.mrb[0].mxu0 %vm131_vm0, %v119_v7  ;;  %445 = vmatpush3.bf16.msra.mxu1 %v442_v40 }
 0x15e   :  { %v418_v9 = vpop.f32.mrb[0].mxu0 }
 0x15f   :  { %v210_v10 = vadd.f32 %v418_v9, %v388_v8  ;;  %v204_v11 = vpop.f32.mrb[1].mxu0 }
 0x160   :  { %v205_v12 = vadd.f32 %v388_v8, %v204_v11 }
 0x161   :  { %v216_v13 = vmul.f32 0.70710677, %v210_v10  ;;  %v214_v20 = vmul.f32 0.5, %v210_v10 }
 0x162   :  { %v215_v14 = vmul.f32 0.70710677, %v205_v12  ;;  %v213_v17 = vmul.f32 0.5, %v205_v12 }
 0x163   :  { %456 = verf.f32 %v216_v13 }
 0x164   :  { %458 = verf.f32 %v215_v14 }
 0x16d   :  { %v457_v15 = vpop.eup %456 }
 0x16e   :  { %v459_v16 = vpop.eup %458  ;;  %v220_v19 = vadd.f32 1.0, %v457_v15 }
 0x16f   :  { %v219_v18 = vadd.f32 1.0, %v459_v16 }
 0x170   :  { %v222_v23 = vmul.f32 %v220_v19, %v214_v20 }
 0x171   :  { %v221_v21 = vmul.f32 %v219_v18, %v213_v17 }
 0x172   :  { %v226_v24 = vsel %vm131_vm0, %v222_v23, 0.0 }
 0x173   :  { %v223_v22 = vsel %vm131_vm0, %v221_v21, 0.0 }
 0x174   :  { %224 = vadd.xlane.f32.xlu0 %v223_v22 }
 0x178   :  { %227 = vadd.xlane.f32.xlu0 %v226_v24 }
 0x201   :  { %v225_v25 = vpop.xlane.xlu0 %224 }
 0x202   :  { %v230_v26 = vmul.f32 0.03125, %v225_v25 }
 0x204   :  { %v232_v27 = vsub.f32 %v221_v21, %v230_v26 }
 0x205   :  { %v228_v28 = vpop.xlane.xlu0 %227 }
 0x206   :  { %v231_v29 = vmul.f32 0.03125, %v228_v28  ;;  %v234_v30 = vmul.f32 %v232_v27, %v232_v27 }
 0x208   :  { %v233_v31 = vsub.f32 %v222_v23, %v231_v29  ;;  %v236_v32 = vsel %vm131_vm0, %v234_v30, 0.0 }
 0x209   :  { %237 = vadd.xlane.f32.xlu1 %v236_v32 }
 0x20a   :  { %v235_v33 = vmul.f32 %v233_v31, %v233_v31 }
 0x20c   :  { %v239_v34 = vsel %vm131_vm0, %v235_v33, 0.0 }
 0x20d   :  { %240 = vadd.xlane.f32.xlu1 %v239_v34 }
 0x296   :  { %v238_v41 = vpop.xlane.xlu1 %237 }
 0x297   :  { %v242_v42 = vmul.f32 0.03125, %v238_v41 }
 0x299   :  { %v244_v43 = vadd.f32 1e-12, %v242_v42 }
 0x29a   :  { %v241_v44 = vpop.xlane.xlu1 %240 }
 0x29b   :  { %460 = vrsqrt.f32 %v244_v43  ;;  %v243_v45 = vmul.f32 0.03125, %v241_v44 }
 0x29d   :  { %v245_v46 = vadd.f32 1e-12, %v243_v45 }
 0x29f   :  { %462 = vrsqrt.f32 %v245_v46 }
 0x2a5   :  { %v461_v47 = vpop.eup %460 }
 0x2a6   :  { %v248_v49 = vmul.f32 %v461_v47, %v232_v27 }
 0x2a8   :  { %v257_v51 = vmul.f32 %v391_v48, %v248_v49 }
 0x2a9   :  { %v463_v52 = vpop.eup %462 }
 0x2aa   :  { %v266_v53 = vadd.f32 %v392_v50, %v257_v51  ;;  %v249_v54 = vmul.f32 %v463_v52, %v233_v31 }
 0x2ac   :  { %268 = vst.msk [vmem:[#allocation2] sm:$0xff] %vm131_vm0, %v266_v53  ;;  %v258_v55 = vmul.f32 %v391_v48, %v249_v54 }
 0x2ae   :  { %v267_v56 = vadd.f32 %v392_v50, %v258_v55 }
 0x2b0   :  { %269 = vst.msk [vmem:[#allocation2 + $0x8] sm:$0xff] %vm131_vm0, %v267_v56 }
 0x2b3   :  { %v270_v57 = vld [vmem:[#allocation2] sm:$0xff] }
 0x2b4   :  { %427 = vmatprep.mubr.msk.f32.mxu1 %vm131_vm0, %v270_v57 }
 0x2b7   :  { %v271_v58 = vld [vmem:[#allocation2 + $0x8] sm:$0xff] }
 0x2b8   :  { %428 = vmatmul.mubr.msk.f32.vlgmr.msra.gmra.mrb[0].mxu1 %vm131_vm0, %v271_v58 }
 0x38b   :  { %v429_v60 = vpop.f32.mrb[0].mxu1 }
 0x38c   :  { %v362_v61 = vadd.f32 %v429_v60, %v393_v59  ;;  %v356_v62 = vpop.f32.mrb[1].mxu1 }
 0x38d   :  { %v357_v63 = vadd.f32 %v393_v59, %v356_v62 }
 0x38e   :  { %367 = vst.msk [vmem:[#allocation15 + $0x8] sm:$0xff] %vm365_vm1, %v362_v61 }
 0x38f   :  { %366 = vst.msk [vmem:[#allocation15] sm:$0xff] %vm365_vm1, %v357_v63 }
 0x390   :  { %629 = shalt.err (!%p626_p4)
}
 0x391   :  { %s630_s20 = scalar_lea.hbm %s840_s7, 256 }
 0x392   :  { %p631_p5 = scmp.ne.s32.totalorder %s840_s7, %s630_s20  ;;  %p634_p6 = scmp.lt.u32.totalorder %s630_s20, %s840_s7 }
 0x394   :  { %p636_p7 = pnand %p634_p6, %p631_p5 }
 0x396   :  { %639 = shalt.err (!%p636_p7)
}
 0x397   :  { %379 = dma.vmem_to_hbm [thread:$0]  %s374_s8, 256, %s840_s7, [#allocation5], %s652_s13, %s652_s13, %s653_s14  }
 0x398   :  { %648 = dma.done.wait [#allocation5], 256  }
 0x399   :  { %649 = vsyncadd [#allocation5], 4294967040 }
 0x39a   :  { %383 = vsyncpa [#allocation4], 1 }
 0x39b   :  { %384 = vsyncpa [#allocation7], 1 }
 0x39c   :  { %385 = vsyncpa [#allocation10], 1 }
 0x39d   :  { %386 = vsyncpa [#allocation13], 1 }
 0x39e   :  { %387 = vsyncpa [#allocation5], 1 }

// kernel: tpu_custom_call.1
= control target key start
LH: loop header
LB: loop body
LE: loop exit
PB: predicated region body
PF: predicated region fallthrough
CT: control target
= control target key end

     0   :  { %12 = vsyncpa [#allocation4], 0  ;;  %s833_s0 = inlined_call_operand.hbm [shape: f32[16,32], index: 0, kind: input, shape index: {}]   ;;  %s834_s1 = inlined_call_operand.hbm [shape: f32[32,32], index: 1, kind: input, shape index: {}]   ;;  %s835_s2 = inlined_call_operand.hbm [shape: f32[1,32], index: 2, kind: input, shape index: {}]   ;;  %s836_s3 = inlined_call_operand.hbm [shape: f32[1,32], index: 3, kind: input, shape index: {}]   ;;  %s837_s4 = inlined_call_operand.hbm [shape: f32[1,32], index: 4, kind: input, shape index: {}]   ;;  %s838_s5 = inlined_call_operand.hbm [shape: f32[32,64], index: 5, kind: input, shape index: {}]   ;;  %s839_s6 = inlined_call_operand.hbm [shape: f32[1,64], index: 6, kind: input, shape index: {}]   ;;  %s840_s7 = inlined_call_operand.hbm [shape: f32[16,64], index: 7, kind: output, shape index: {}]  }
   0x1   :  { %13 = vsyncpa [#allocation7], 0 }
   0x2   :  { %14 = vsyncpa [#allocation10], 0 }
   0x3   :  { %15 = vsyncpa [#allocation13], 0 }
   0x4   :  { %16 = vsyncpa [#allocation5], 0  ;;  %s650_s24 = smov [#allocation6]   ;;  %s651_s26 = smov [#allocation9]  }
   0x5   :  { %s34_s25 = sshll.u32 %s650_s24, 4  ;;  %s57_s27 = sshll.u32 %s651_s26, 4  ;;  %s35_s25 = int_to_ptr.vmem [resolvable:$true] %s34_s25  ;;  %s700_s27 = int_to_ptr.vmem [resolvable:$true] %s57_s27 }
   0x6   :  { %s464_s30 = scalar_lea.hbm %s834_s1, 512 }
   0x7   :  { %p465_p0 = scmp.ne.s32.totalorder %s834_s1, %s464_s30  ;;  %p468_p1 = scmp.lt.u32.totalorder %s464_s30, %s834_s1 }
   0x9   :  { %p470_p2 = pnand %p468_p1, %p465_p0 }
   0xb   :  { %473 = shalt.err (!%p470_p2)
}
   0xc   :  { %s474_s12 = scalar_lea.vmem %s35_s25, 512  ;;  %p479_p4 = scmp.lt.s32.totalorder %s35_s25, %s35_s25 }
   0xd   :  { %p475_p3 = scmp.ne.s32.totalorder %s35_s25, %s474_s12  ;;  %p480_p5 = scmp.lt.s32.totalorder %s474_s12, %s474_s12 }
   0xf   :  { %p481_p6 = por %p480_p5, %p479_p4 }
  0x11   :  { %p482_p7 = pnand %p481_p6, %p475_p3 }
  0x13   :  { %485 = shalt.err (!%p482_p7)
}
  0x14   :  { %s652_s13 = smov 128   ;;  %s653_s14 = smov 8  }
  0x15   :  { %40 = dma.hbm_to_vmem [thread:$0]  %s834_s1, 512, %s35_s25, [#allocation7], %s652_s13, %s652_s13, %s653_s14  }
  0x16   :  { %s486_s19 = scalar_lea.hbm %s836_s3, 16 }
  0x17   :  { %p487_p8 = scmp.ne.s32.totalorder %s836_s3, %s486_s19  ;;  %p490_p9 = scmp.lt.u32.totalorder %s486_s19, %s836_s3 }
  0x19   :  { %p492_p10 = pnand %p490_p9, %p487_p8 }
  0x1b   :  { %495 = shalt.err (!%p492_p10)
}
  0x1c   :  { %s496_s24 = scalar_lea.vmem %s700_s27, 16  ;;  %s500_s1 = scalar_lea.vmem %s700_s27, 32 }
  0x1d   :  { %p497_p11 = scmp.ne.s32.totalorder %s700_s27, %s496_s24  ;;  %p501_p12 = scmp.lt.s32.totalorder %s700_s27, %s700_s27 }
  0x1e   :  { %p502_p13 = scmp.lt.s32.totalorder %s500_s1, %s496_s24 }
  0x20   :  { %p503_p0 = por %p502_p13, %p501_p12 }
  0x22   :  { %p504_p1 = pnand %p503_p0, %p497_p11 }
  0x24   :  { %507 = shalt.err (!%p504_p1)
}
  0x25   :  { %60 = dma.hbm_to_vmem [thread:$0]  %s836_s3, 16, %s700_s27, [#allocation10]  }
  0x26   :  { %s654_s28 = smov [#allocation12]   ;;  %s655_s30 = smov [#allocation3]  }
  0x27   :  { %s76_s29 = sshll.u32 %s654_s28, 4  ;;  %s22_s8 = sshll.u32 %s655_s30, 4  ;;  %s77_s29 = int_to_ptr.vmem [resolvable:$true] %s76_s29  ;;  %s735_s8 = int_to_ptr.vmem [resolvable:$true] %s22_s8 }
  0x28   :  { %s508_s11 = scalar_lea.hbm %s838_s5, 512 }
  0x29   :  { %p509_p2 = scmp.ne.s32.totalorder %s838_s5, %s508_s11  ;;  %p512_p3 = scmp.lt.u32.totalorder %s508_s11, %s838_s5 }
  0x2b   :  { %p514_p4 = pnand %p512_p3, %p509_p2 }
  0x2d   :  { %517 = shalt.err (!%p514_p4)
}
  0x2e   :  { %s518_s3 = scalar_lea.vmem %s77_s29, 512  ;;  %p523_p6 = scmp.lt.s32.totalorder %s77_s29, %s77_s29 }
  0x2f   :  { %p519_p5 = scmp.ne.s32.totalorder %s77_s29, %s518_s3  ;;  %p524_p7 = scmp.lt.s32.totalorder %s518_s3, %s518_s3 }
  0x31   :  { %p525_p8 = por %p524_p7, %p523_p6 }
  0x33   :  { %p526_p9 = pnand %p525_p8, %p519_p5 }
  0x35   :  { %529 = shalt.err (!%p526_p9)
}
  0x36   :  { %82 = dma.hbm_to_vmem [thread:$0]  %s838_s5, 512, %s77_s29, [#allocation13], %s652_s13, %s652_s13, %s653_s14  }
  0x37   :  { %s530_s21 = scalar_lea.hbm %s833_s0, 256 }
  0x38   :  { %p531_p10 = scmp.ne.s32.totalorder %s833_s0, %s530_s21  ;;  %p534_p11 = scmp.lt.u32.totalorder %s530_s21, %s833_s0 }
  0x3a   :  { %p536_p12 = pnand %p534_p11, %p531_p10 }
  0x3c   :  { %539 = shalt.err (!%p536_p12)
}
  0x3d   :  { %s540_s25 = scalar_lea.vmem %s735_s8, 256  ;;  %p545_p0 = scmp.lt.s32.totalorder %s735_s8, %s735_s8 }
  0x3e   :  { %p541_p13 = scmp.ne.s32.totalorder %s735_s8, %s540_s25  ;;  %p546_p1 = scmp.lt.s32.totalorder %s540_s25, %s540_s25 }
  0x40   :  { %p547_p2 = por %p546_p1, %p545_p0 }
  0x42   :  { %p548_p3 = pnand %p547_p2, %p541_p13 }
  0x44   :  { %551 = shalt.err (!%p548_p3)
}
  0x45   :  { %28 = dma.hbm_to_vmem [thread:$0]  %s833_s0, 256, %s735_s8, [#allocation4], %s652_s13, %s652_s13, %s653_s14  }
  0x46   :  { %s656_s28 = smov [#allocation8]   ;;  %s657_s30 = smov [#allocation11]  }
  0x47   :  { %s47_s29 = sshll.u32 %s656_s28, 4  ;;  %s67_s9 = sshll.u32 %s657_s30, 4  ;;  %s48_s29 = int_to_ptr.vmem [resolvable:$true] %s47_s29  ;;  %s68_s9 = int_to_ptr.vmem [resolvable:$true] %s67_s9 }
  0x48   :  { %s552_s12 = scalar_lea.hbm %s835_s2, 16 }
  0x49   :  { %p553_p4 = scmp.ne.s32.totalorder %s835_s2, %s552_s12  ;;  %p556_p5 = scmp.lt.u32.totalorder %s552_s12, %s835_s2 }
  0x4b   :  { %p558_p6 = pnand %p556_p5, %p553_p4 }
  0x4d   :  { %561 = shalt.err (!%p558_p6)
}
  0x4e   :  { %s562_s0 = scalar_lea.vmem %s48_s29, 16  ;;  %s566_s8 = scalar_lea.vmem %s48_s29, 32 }
  0x4f   :  { %p563_p7 = scmp.ne.s32.totalorder %s48_s29, %s562_s0  ;;  %p567_p8 = scmp.lt.s32.totalorder %s48_s29, %s48_s29 }
  0x50   :  { %p568_p9 = scmp.lt.s32.totalorder %s566_s8, %s562_s0 }
  0x52   :  { %p569_p10 = por %p568_p9, %p567_p8 }
  0x54   :  { %p570_p11 = pnand %p569_p10, %p563_p7 }
  0x56   :  { %573 = shalt.err (!%p570_p11)
}
  0x57   :  { %50 = dma.hbm_to_vmem [thread:$0]  %s835_s2, 16, %s48_s29, [#allocation7]  }
  0x58   :  { %s574_s21 = scalar_lea.hbm %s837_s4, 16 }
  0x59   :  { %p575_p12 = scmp.ne.s32.totalorder %s837_s4, %s574_s21  ;;  %p578_p13 = scmp.lt.u32.totalorder %s574_s21, %s837_s4 }
  0x5b   :  { %p580_p0 = pnand %p578_p13, %p575_p12 }
  0x5d   :  { %583 = shalt.err (!%p580_p0)
}
  0x5e   :  { %s584_s25 = scalar_lea.vmem %s68_s9, 16  ;;  %s588_s5 = scalar_lea.vmem %s68_s9, 32 }
  0x5f   :  { %p585_p1 = scmp.ne.s32.totalorder %s68_s9, %s584_s25  ;;  %p589_p2 = scmp.lt.s32.totalorder %s68_s9, %s68_s9 }
  0x60   :  { %p590_p3 = scmp.lt.s32.totalorder %s588_s5, %s584_s25 }
  0x62   :  { %p591_p4 = por %p590_p3, %p589_p2 }
  0x64   :  { %p592_p5 = pnand %p591_p4, %p585_p1 }
  0x66   :  { %595 = shalt.err (!%p592_p5)
}
  0x67   :  { %70 = dma.hbm_to_vmem [thread:$0]  %s837_s4, 16, %s68_s9, [#allocation10]  }
  0x68   :  { %s658_s28 = smov [#allocation14]   ;;  %s596_s11 = scalar_lea.hbm %s839_s6, 16 }
  0x69   :  { %s89_s29 = sshll.u32 %s658_s28, 4  ;;  %p597_p6 = scmp.ne.s32.totalorder %s839_s6, %s596_s11  ;;  %s90_s29 = int_to_ptr.vmem [resolvable:$true] %s89_s29 }
  0x6a   :  { %p600_p7 = scmp.lt.u32.totalorder %s596_s11, %s839_s6 }
  0x6c   :  { %p602_p8 = pnand %p600_p7, %p597_p6 }
  0x6e   :  { %605 = shalt.err (!%p602_p8)
}
  0x6f   :  { %s606_s3 = scalar_lea.vmem %s90_s29, 16  ;;  %s610_s4 = scalar_lea.vmem %s90_s29, 32 }
  0x70   :  { %p607_p9 = scmp.ne.s32.totalorder %s90_s29, %s606_s3  ;;  %p611_p10 = scmp.lt.s32.totalorder %s90_s29, %s90_s29 }
  0x71   :  { %p612_p11 = scmp.lt.s32.totalorder %s610_s4, %s606_s3 }
  0x73   :  { %p613_p12 = por %p612_p11, %p611_p10 }
  0x75   :  { %p614_p13 = pnand %p613_p12, %p607_p9 }
  0x77   :  { %617 = shalt.err (!%p614_p13)
}
  0x78   :  { %92 = dma.hbm_to_vmem [thread:$0]  %s839_s6, 16, %s90_s29, [#allocation13]  }
  0x79   :  { %640 = dma.done.wait [#allocation4], 256  }
  0x7a   :  { %641 = vsyncadd [#allocation4], 4294967040 }
  0x7b   :  { %642 = dma.done.wait [#allocation7], 528  }
  0x7c   :  { %643 = vsyncadd [#allocation7], 4294966768 }
  0x7d   :  { %644 = dma.done.wait [#allocation10], 32  }
  0x7e   :  { %645 = vsyncadd [#allocation10], 4294967264 }
  0x7f   :  { %646 = dma.done.wait [#allocation13], 528  }
  0x80   :  { %647 = vsyncadd [#allocation13], 4294966768  ;;  %vm131_vm0 = vcmask 261120   ;;  %v120_v0 = vld [vmem:[#allocation6] sm:$0xff]  ;;  %v121_v1 = vld [vmem:[#allocation6 + $0x8] sm:$0xff]  ;;  %s659_s6 = smov [#allocation15]  }
  0x81   :  { %v122_v2 = vld [vmem:[#allocation6 + $0x10] sm:$0xff]  ;;  %v430_v3 = vpack.c.bf16 %v121_v1, %v120_v0  ;;  %v123_v4 = vld [vmem:[#allocation6 + $0x18] sm:$0xff]  ;;  %v388_v8 = vld [vmem:[#allocation8] ss:$0 sm:$0xff]  ;;  %s373_s8 = sshll.u32 %s659_s6, 4  ;;  %vm365_vm1 = vcmask 523264   ;;  %s374_s8 = int_to_ptr.vmem [resolvable:$true] %s373_s8 }
  0x82   :  { %v118_v5 = vld [vmem:[#allocation3] sm:$0xff]  ;;  %v434_v6 = vpack.c.bf16 %v123_v4, %v122_v2  ;;  %v119_v7 = vld [vmem:[#allocation3 + $0x8] sm:$0xff]  ;;  %v272_v35 = vld [vmem:[#allocation12] sm:$0xff]  ;;  %s618_s27 = scalar_lea.vmem %s374_s8, 256  ;;  %p623_p1 = scmp.lt.s32.totalorder %s374_s8, %s374_s8 }
  0x83   :  { %416 = vmatprep.mubr.msk.f32.mxu0 %vm131_vm0, %v118_v5  ;;  %431 = vmatprep.subr.bf16.mxu0 %v430_v3  ;;  %v273_v36 = vld [vmem:[#allocation12 + $0x8] sm:$0xff]  ;;  %v274_v38 = vld [vmem:[#allocation12 + $0x10] sm:$0xff]  ;;  %v275_v39 = vld [vmem:[#allocation12 + $0x18] sm:$0xff]  ;;  %p619_p0 = scmp.ne.s32.totalorder %s374_s8, %s618_s27  ;;  %p624_p2 = scmp.lt.s32.totalorder %s618_s27, %s618_s27 }
  0x84   :  { %433 = vmatpush3.bf16.msra.mxu0 %v430_v3  ;;  %v438_v37 = vpack.c.bf16 %v273_v36, %v272_v35  ;;  %v442_v40 = vpack.c.bf16 %v275_v39, %v274_v38  ;;  %v391_v48 = vld [vmem:[#allocation9] ss:$0 sm:$0xff]  ;;  %v392_v50 = vld [vmem:[#allocation11] ss:$0 sm:$0xff]  ;;  %v393_v59 = vld [vmem:[#allocation14] ss:$0 sm:$0xff] }
  0x85   :  { %435 = vmatprep.subr.bf16.mxu0 %v434_v6  ;;  %p625_p3 = por %p624_p2, %p623_p1 }
  0x86   :  { %439 = vmatprep.subr.bf16.mxu1 %v438_v37 }
  0x87   :  { %441 = vmatpush3.bf16.msra.mxu1 %v438_v37  ;;  %p626_p4 = pnand %p625_p3, %p619_p0 }
  0x88   :  { %437 = vmatpush3.bf16.msra.mxu0 %v434_v6  ;;  %443 = vmatprep.subr.bf16.mxu1 %v442_v40 }
  0x8b   :  { %417 = vmatmul.mubr.msk.f32.vlgmr.msra.gmra.mrb[0].mxu0 %vm131_vm0, %v119_v7  ;;  %445 = vmatpush3.bf16.msra.mxu1 %v442_v40 }
 0x15e   :  { %v418_v9 = vpop.f32.mrb[0].mxu0 }
 0x15f   :  { %v210_v10 = vadd.f32 %v418_v9, %v388_v8  ;;  %v204_v11 = vpop.f32.mrb[1].mxu0 }
 0x160   :  { %v205_v12 = vadd.f32 %v388_v8, %v204_v11 }
 0x161   :  { %v216_v13 = vmul.f32 0.70710677, %v210_v10  ;;  %v214_v20 = vmul.f32 0.5, %v210_v10 }
 0x162   :  { %v215_v14 = vmul.f32 0.70710677, %v205_v12  ;;  %v213_v17 = vmul.f32 0.5, %v205_v12 }
 0x163   :  { %456 = verf.f32 %v216_v13 }
 0x164   :  { %458 = verf.f32 %v215_v14 }
 0x16d   :  { %v457_v15 = vpop.eup %456 }
 0x16e   :  { %v459_v16 = vpop.eup %458  ;;  %v220_v19 = vadd.f32 1.0, %v457_v15 }
 0x16f   :  { %v219_v18 = vadd.f32 1.0, %v459_v16 }
 0x170   :  { %v222_v23 = vmul.f32 %v220_v19, %v214_v20 }
 0x171   :  { %v221_v21 = vmul.f32 %v219_v18, %v213_v17 }
 0x172   :  { %v226_v24 = vsel %vm131_vm0, %v222_v23, 0.0 }
 0x173   :  { %v223_v22 = vsel %vm131_vm0, %v221_v21, 0.0 }
 0x174   :  { %224 = vadd.xlane.f32.xlu0 %v223_v22 }
 0x178   :  { %227 = vadd.xlane.f32.xlu0 %v226_v24 }
 0x201   :  { %v225_v25 = vpop.xlane.xlu0 %224 }
 0x202   :  { %v230_v26 = vmul.f32 0.03125, %v225_v25 }
 0x204   :  { %v232_v27 = vsub.f32 %v221_v21, %v230_v26 }
 0x205   :  { %v228_v28 = vpop.xlane.xlu0 %227 }
 0x206   :  { %v231_v29 = vmul.f32 0.03125, %v228_v28  ;;  %v234_v30 = vmul.f32 %v232_v27, %v232_v27 }
 0x208   :  { %v233_v31 = vsub.f32 %v222_v23, %v231_v29  ;;  %v236_v32 = vsel %vm131_vm0, %v234_v30, 0.0 }
 0x209   :  { %237 = vadd.xlane.f32.xlu1 %v236_v32 }
 0x20a   :  { %v235_v33 = vmul.f32 %v233_v31, %v233_v31 }
 0x20c   :  { %v239_v34 = vsel %vm131_vm0, %v235_v33, 0.0 }
 0x20d   :  { %240 = vadd.xlane.f32.xlu1 %v239_v34 }
 0x296   :  { %v238_v41 = vpop.xlane.xlu1 %237 }
 0x297   :  { %v242_v42 = vmul.f32 0.03125, %v238_v41 }
 0x299   :  { %v244_v43 = vadd.f32 1e-12, %v242_v42 }
 0x29a   :  { %v241_v44 = vpop.xlane.xlu1 %240 }
 0x29b   :  { %460 = vrsqrt.f32 %v244_v43  ;;  %v243_v45 = vmul.f32 0.03125, %v241_v44 }
 0x29d   :  { %v245_v46 = vadd.f32 1e-12, %v243_v45 }
 0x29f   :  { %462 = vrsqrt.f32 %v245_v46 }
 0x2a5   :  { %v461_v47 = vpop.eup %460 }
 0x2a6   :  { %v248_v49 = vmul.f32 %v461_v47, %v232_v27 }
 0x2a8   :  { %v257_v51 = vmul.f32 %v391_v48, %v248_v49 }
 0x2a9   :  { %v463_v52 = vpop.eup %462 }
 0x2aa   :  { %v266_v53 = vadd.f32 %v392_v50, %v257_v51  ;;  %v249_v54 = vmul.f32 %v463_v52, %v233_v31 }
 0x2ac   :  { %268 = vst.msk [vmem:[#allocation2] sm:$0xff] %vm131_vm0, %v266_v53  ;;  %v258_v55 = vmul.f32 %v391_v48, %v249_v54 }
 0x2ae   :  { %v267_v56 = vadd.f32 %v392_v50, %v258_v55 }
 0x2b0   :  { %269 = vst.msk [vmem:[#allocation2 + $0x8] sm:$0xff] %vm131_vm0, %v267_v56 }
 0x2b3   :  { %v270_v57 = vld [vmem:[#allocation2] sm:$0xff] }
 0x2b4   :  { %427 = vmatprep.mubr.msk.f32.mxu1 %vm131_vm0, %v270_v57 }
 0x2b7   :  { %v271_v58 = vld [vmem:[#allocation2 + $0x8] sm:$0xff] }
 0x2b8   :  { %428 = vmatmul.mubr.msk.f32.vlgmr.msra.gmra.mrb[0].mxu1 %vm131_vm0, %v271_v58 }
 0x38b   :  { %v429_v60 = vpop.f32.mrb[0].mxu1 }
 0x38c   :  { %v362_v61 = vadd.f32 %v429_v60, %v393_v59  ;;  %v356_v62 = vpop.f32.mrb[1].mxu1 }
 0x38d   :  { %v357_v63 = vadd.f32 %v393_v59, %v356_v62 }
 0x38e   :  { %367 = vst.msk [vmem:[#allocation15 + $0x8] sm:$0xff] %vm365_vm1, %v362_v61 }
 0x38f   :  { %366 = vst.msk [vmem:[#allocation15] sm:$0xff] %vm365_vm1, %v357_v63 }
 0x390   :  { %629 = shalt.err (!%p626_p4)
}
 0x391   :  { %s630_s20 = scalar_lea.hbm %s840_s7, 256 }
 0x392   :  { %p631_p5 = scmp.ne.s32.totalorder %s840_s7, %s630_s20  ;;  %p634_p6 = scmp.lt.u32.totalorder %s630_s20, %s840_s7 }
 0x394   :  { %p636_p7 = pnand %p634_p6, %p631_p5 }
 0x396   :  { %639 = shalt.err (!%p636_p7)
}
 0x397   :  { %379 = dma.vmem_to_hbm [thread:$0]  %s374_s8, 256, %s840_s7, [#allocation5], %s652_s13, %s652_s13, %s653_s14  }
 0x398   :  { %648 = dma.done.wait [#allocation5], 256  }
 0x399   :  { %649 = vsyncadd [#allocation5], 4294967040 }
 0x39a   :  { %383 = vsyncpa [#allocation4], 1 }
 0x39b   :  { %384 = vsyncpa [#allocation7], 1 }
 0x39c   :  { %385 = vsyncpa [#allocation10], 1 }
 0x39d   :  { %386 = vsyncpa [#allocation13], 1 }
 0x39e   :  { %387 = vsyncpa [#allocation5], 1 }

</bundles_post_ra>
